<compile_context>
chip_gen: v7x
topology: tpu7x:2x2x1
jax: 0.10.0
libtpu: 0.0.40
codegen_flags: <defaults>
</compile_context>

<pallas_src>
import jax
import jax.numpy as jnp
from jax.experimental import pallas as pl
from jax.experimental.pallas import tpu as pltpu


def _round_up(x: int, m: int) -> int:
    return ((x + m - 1) // m) * m


def _vmem_capacity_bytes(default: int = 64 << 20) -> int:
    """Per-core VMEM capacity; conservative fallback if the query fails."""
    try:
        cap = getattr(pltpu.get_tpu_info(), "vmem_capacity_bytes", None)
        if cap:
            return int(cap)
    except Exception:
        pass
    return default


def _patch_embed_kernel(x_ref, w_ref, b_ref, o_ref):
    # x_ref: (TM, K) compute dtype   w_ref: (K, E) compute dtype (VMEM-resident)
    # b_ref: (1, E)  f32             o_ref: (TM, E) out dtype
    acc = jnp.dot(x_ref[...], w_ref[...], preferred_element_type=jnp.float32)
    o_ref[...] = (acc + b_ref[...]).astype(o_ref.dtype)


def patch_embedding_forward(x, conv_weight, conv_bias, patch_size, *,
                            compute_dtype=jnp.bfloat16, out_dtype=None,
                            tile_m=1024):
    """Equivalent of PatchEmbedding.forward.

    x:           (B, C, H, W) float32
    conv_weight: (E, C, P, P) float32
    conv_bias:   (E,)         float32
    returns:     (B, (H//P)*(W//P), E) in `out_dtype` (default: compute_dtype)
    """
    B, C, H, W = x.shape
    E = conv_weight.shape[0]
    P = patch_size
    assert H % P == 0 and W % P == 0, "image size must be divisible by patch size"
    nph, npw = H // P, W // P
    n_patches = nph * npw
    M = B * n_patches
    K = C * P * P
    if out_dtype is None:
        out_dtype = compute_dtype

    # Cast to the compute dtype BEFORE the transpose/pad chain: the XLA copy that
    # materializes the patch matrix then moves 2-byte instead of 4-byte elements.
    x = x.astype(compute_dtype)
    conv_weight = conv_weight.astype(compute_dtype)

    # NHWC-style patch extraction (contiguous lane access), flatten each patch in
    # (kh, kw, c) order; the weight is reordered to the same contraction order.
    patches = (
        x.transpose(0, 2, 3, 1)                    # (B, H, W, C)
        .reshape(B, nph, P, npw, P, C)             # (b, i, kh, j, kw, c)
        .transpose(0, 1, 3, 2, 4, 5)               # (b, i, j, kh, kw, c)
        .reshape(M, K)
    )
    w_mat = conv_weight.transpose(2, 3, 1, 0).reshape(K, E)    # (kh, kw, c) x E
    b_mat = conv_bias.reshape(1, E).astype(jnp.float32)

    # Pad K and E to multiples of 128: full-width MXU pushes, lane-dense output.
    K_pad = _round_up(K, 128)
    E_pad = _round_up(E, 128)
    if K_pad != K:
        patches = jnp.pad(patches, ((0, 0), (0, K_pad - K)))
        w_mat = jnp.pad(w_mat, ((0, K_pad - K), (0, 0)))
    if E_pad != E:
        w_mat = jnp.pad(w_mat, ((0, 0), (0, E_pad - E)))
        b_mat = jnp.pad(b_mat, ((0, 0), (0, E_pad - E)))

    in_bytes = jnp.dtype(compute_dtype).itemsize
    out_bytes = jnp.dtype(out_dtype).itemsize

    # ---- Tile selection -----------------------------------------------------
    # Start from a large tile (amortizes ~0.35 us per grid step), 16-row aligned
    # for bf16 sublane packing.
    TM = min(tile_m, _round_up(M, 16))
    # Make sure the M grid has >= 2 steps when there is enough work, so the
    # "parallel" axis can actually be sharded across v7x's two TensorCores.
    if _round_up(M, TM) // TM < 2 and M > 256:
        TM = _round_up((M + 1) // 2, 16)

    # VMEM requirement: every BlockSpec (including the constant-index weight/bias)
    # is double-buffered by the pipeline, so count them at 2x.
    def _vmem_need(tm):
        return (2 * K_pad * E_pad * in_bytes        # weight (2 pipeline buffers)
                + 2 * 8 * E_pad * 4                 # bias, sublane-padded, 2 buffers
                + 2 * tm * K_pad * in_bytes         # streamed patch tiles
                + 2 * tm * E_pad * out_bytes)       # streamed output tiles

    vmem_cap = _vmem_capacity_bytes()
    budget = vmem_cap - max(8 << 20, vmem_cap // 8)   # leave compiler headroom
    while _vmem_need(TM) > budget and TM > 64:
        TM = max(64, _round_up(TM // 2, 16))

    M_pad = _round_up(M, TM)
    if M_pad != M:
        patches = jnp.pad(patches, ((0, M_pad - M), (0, 0)))
    nm = M_pad // TM

    need = _vmem_need(TM)
    vmem_limit = int(min(max(need + (8 << 20), 32 << 20), max(budget, need)))
    vmem_limit = max(vmem_limit, need)   # never clamp below the real requirement

    cost = pl.CostEstimate(
        flops=2 * M_pad * K_pad * E_pad,
        transcendentals=0,
        bytes_accessed=(M_pad * K_pad * in_bytes
                        + K_pad * E_pad * in_bytes
                        + M_pad * E_pad * out_bytes
                        + E_pad * 4),
    )

    out = pl.pallas_call(
        _patch_embed_kernel,
        out_shape=jax.ShapeDtypeStruct((M_pad, E_pad), out_dtype),
        grid=(nm,),
        in_specs=[
            pl.BlockSpec((TM, K_pad), lambda i: (i, 0)),       # streamed patch tiles
            pl.BlockSpec((K_pad, E_pad), lambda i: (0, 0)),    # weight: VMEM-resident
            pl.BlockSpec((1, E_pad), lambda i: (0, 0)),        # bias:   VMEM-resident
        ],
        out_specs=pl.BlockSpec((TM, E_pad), lambda i: (i, 0)),
        compiler_params=pltpu.CompilerParams(
            dimension_semantics=("parallel",),
            vmem_limit_bytes=vmem_limit,
        ),
        cost_estimate=cost,
    )(patches, w_mat, b_mat)

    if M_pad != M or E_pad != E:
        out = out[:M, :E]
    return out.reshape(B, n_patches, E)


if __name__ == "__main__":
    # Small shapes consistent with the module:
    #   batch=2, in_channels=4, image=16x16, patch_size=8, embedding_dim=32
    B, C, H, W = 2, 4, 16, 16
    P = 8
    E = 32

    key = jax.random.PRNGKey(0)
    kx, kw, kb = jax.random.split(key, 3)
    x = jax.random.normal(kx, (B, C, H, W), dtype=jnp.float32)
    conv_weight = jax.random.normal(kw, (E, C, P, P), dtype=jnp.float32) * 0.02
    conv_bias = jax.random.normal(kb, (E,), dtype=jnp.float32) * 0.02

    out = patch_embedding_forward(x, conv_weight, conv_bias, P)
    out = jax.block_until_ready(out)

    # Pure-JAX f32 reference of the same computation (patch-matmul == strided conv).
    nph, npw = H // P, W // P
    patches_ref = (
        x.reshape(B, C, nph, P, npw, P)
        .transpose(0, 2, 4, 1, 3, 5)
        .reshape(B, nph * npw, C * P * P)
    )
    ref = patches_ref @ conv_weight.reshape(E, -1).T + conv_bias

    assert out.shape == (B, nph * npw, E)
    out_f32 = out.astype(jnp.float32)
    # Kernel computes and stores in bf16 (f32 accumulation) -> bf16-level tolerance.
    err = float(jnp.max(jnp.abs(out_f32 - ref)))
    assert jnp.allclose(out_f32, ref, atol=3e-2, rtol=3e-2), err

    print("KERNEL_OK")
</pallas_src>

<mosaic_0001>
module attributes {stable_mosaic.version = 11 : i64} {
  func.func @_patch_embed_kernel(%arg0: i32, %arg1: memref<16x256xbf16, #tpu.memory_space<vmem>>, %arg2: memref<256x128xbf16, #tpu.memory_space<vmem>>, %arg3: memref<1x128xf32, #tpu.memory_space<vmem>>, %arg4: memref<16x128xbf16, #tpu.memory_space<vmem>>) attributes {dimension_semantics = [#tpu.dimension_semantics<parallel>], iteration_bounds = array<i64: 1>, scalar_prefetch = 0 : i64, scratch_operands = 0 : i64, tpu.core_type = #tpu.core_type<tc>, window_params = [{transform_indices = @transform_0, window_bounds = array<i64: 16, 256>}, {pipeline_mode = #tpu.pipeline_mode<synchronous>, transform_indices = @transform_1, window_bounds = array<i64: 256, 128>}, {pipeline_mode = #tpu.pipeline_mode<synchronous>, transform_indices = @transform_2, window_bounds = array<i64: 1, 128>}, {transform_indices = @transform_3, window_bounds = array<i64: 16, 128>}]} {
    %c0 = arith.constant 0 : index
    %c0_0 = arith.constant 0 : index
    %0 = vector.load %arg1[%c0, %c0_0] : memref<16x256xbf16, #tpu.memory_space<vmem>>, vector<16x256xbf16>
    %c0_1 = arith.constant 0 : index
    %c0_2 = arith.constant 0 : index
    %1 = vector.load %arg2[%c0_1, %c0_2] : memref<256x128xbf16, #tpu.memory_space<vmem>>, vector<256x128xbf16>
    %cst = arith.constant dense<0.000000e+00> : vector<16x128xf32>
    %2 = tpu.matmul %0, %1, %cst {dimension_numbers = #tpu.dot_dimension_numbers<[1], [0], [0], [1], [0, 0, 1, 1], [], []>} : vector<16x256xbf16>, vector<256x128xbf16>, vector<16x128xf32> -> vector<16x128xf32>
    %c0_3 = arith.constant 0 : index
    %c0_4 = arith.constant 0 : index
    %3 = vector.load %arg3[%c0_3, %c0_4] : memref<1x128xf32, #tpu.memory_space<vmem>>, vector<1x128xf32>
    %4 = vector.broadcast %3 : vector<1x128xf32> to vector<16x128xf32>
    %5 = arith.addf %2, %4 : vector<16x128xf32>
    %6 = arith.truncf %5 : vector<16x128xf32> to vector<16x128xbf16>
    %c0_5 = arith.constant 0 : index
    %c0_6 = arith.constant 0 : index
    %7 = vector.load %arg4[%c0_5, %c0_6] : memref<16x128xbf16, #tpu.memory_space<vmem>>, vector<16x128xbf16>
    tpu.vector_store %arg4[%c0_5, %c0_6], %6 {strides = array<i32>} : memref<16x128xbf16, #tpu.memory_space<vmem>>, vector<16x128xbf16>,
    return
  }
  func.func @transform_0(%arg0: i32) -> (i32, i32) {
    %c0_i32 = arith.constant 0 : i32
    %c0_i32_0 = arith.constant 0 : i32
    return %arg0, %c0_i32 : i32, i32
  }
  func.func @transform_1(%arg0: i32) -> (i32, i32) {
    %c0_i32 = arith.constant 0 : i32
    %c0_i32_0 = arith.constant 0 : i32
    %c0_i32_1 = arith.constant 0 : i32
    return %c0_i32, %c0_i32_0 : i32, i32
  }
  func.func @transform_2(%arg0: i32) -> (i32, i32) {
    %c0_i32 = arith.constant 0 : i32
    %c0_i32_0 = arith.constant 0 : i32
    %c0_i32_1 = arith.constant 0 : i32
    return %c0_i32, %c0_i32_0 : i32, i32
  }
  func.func @transform_3(%arg0: i32) -> (i32, i32) {
    %c0_i32 = arith.constant 0 : i32
    %c0_i32_0 = arith.constant 0 : i32
    return %arg0, %c0_i32 : i32, i32
  }
}

</mosaic_0001>

<bundles_post_ra>
// kernel: tpu_custom_call.1
= control target key start
LH: loop header
LB: loop body
LE: loop exit
PB: predicated region body
PF: predicated region fallthrough
CT: control target
= control target key end

     0   :  { %8 = vsyncpa [#allocation3], 0  ;;  %s480_s0 = inlined_call_operand.hbm [shape: bf16[16,256], index: 0, kind: input, shape index: {}]   ;;  %s481_s1 = inlined_call_operand.hbm [shape: bf16[256,128], index: 1, kind: input, shape index: {}]   ;;  %s482_s2 = inlined_call_operand.vmem [shape: f32[1,128], index: 2, kind: input, shape index: {}]   ;;  %s483_s3 = inlined_call_operand.hbm [shape: bf16[16,128], index: 3, kind: output, shape index: {}]  }
   0x1   :  { %9 = vsyncpa [#allocation6], 0 }
   0x2   :  { %10 = vsyncpa [#allocation4], 0  ;;  %s408_s12 = smov [#allocation2]   ;;  %s336_s16 = scalar_lea.hbm %s480_s0, 256 }
   0x3   :  { %s16_s13 = sshll.u32 %s408_s12, 4  ;;  %p337_p0 = scmp.ne.s32.totalorder %s480_s0, %s336_s16  ;;  %s17_s13 = int_to_ptr.vmem [resolvable:$true] %s16_s13 }
   0x4   :  { %p340_p1 = scmp.lt.u32.totalorder %s336_s16, %s480_s0 }
   0x6   :  { %p342_p2 = pnand %p340_p1, %p337_p0 }
   0x8   :  { %345 = shalt.err (!%p342_p2)
}
   0x9   :  { %s346_s21 = scalar_lea.vmem %s17_s13, 256  ;;  %p351_p4 = scmp.lt.s32.totalorder %s17_s13, %s17_s13 }
   0xa   :  { %p347_p3 = scmp.ne.s32.totalorder %s17_s13, %s346_s21  ;;  %p352_p5 = scmp.lt.s32.totalorder %s346_s21, %s346_s21 }
   0xc   :  { %p353_p6 = por %p352_p5, %p351_p4 }
   0xe   :  { %p354_p7 = pnand %p353_p6, %p347_p3 }
  0x10   :  { %357 = shalt.err (!%p354_p7)
}
  0x11   :  { %s409_s22 = smov 128   ;;  %s410_s23 = smov 8  }
  0x12   :  { %22 = dma.hbm_to_vmem [thread:$0]  %s480_s0, 256, %s17_s13, [#allocation3], %s409_s22, %s409_s22, %s410_s23  }
  0x13   :  { %s411_s26 = smov [#allocation5]   ;;  %s358_s30 = scalar_lea.hbm %s481_s1, 2048 }
  0x14   :  { %s28_s27 = sshll.u32 %s411_s26, 4  ;;  %p359_p8 = scmp.ne.s32.totalorder %s481_s1, %s358_s30  ;;  %s29_s27 = int_to_ptr.vmem [resolvable:$true] %s28_s27 }
  0x15   :  { %p362_p9 = scmp.lt.u32.totalorder %s358_s30, %s481_s1 }
  0x17   :  { %p364_p10 = pnand %p362_p9, %p359_p8 }
  0x19   :  { %367 = shalt.err (!%p364_p10)
}
  0x1a   :  { %s368_s8 = scalar_lea.vmem %s29_s27, 2048  ;;  %p373_p12 = scmp.lt.s32.totalorder %s29_s27, %s29_s27 }
  0x1b   :  { %p369_p11 = scmp.ne.s32.totalorder %s29_s27, %s368_s8  ;;  %p374_p13 = scmp.lt.s32.totalorder %s368_s8, %s368_s8 }
  0x1d   :  { %p375_p0 = por %p374_p13, %p373_p12 }
  0x1f   :  { %p376_p1 = pnand %p375_p0, %p369_p11 }
  0x21   :  { %379 = shalt.err (!%p376_p1)
}
  0x22   :  { %s412_s0 = smov 64   ;;  %s413_s9 = smov 4  }
  0x23   :  { %34 = dma.hbm_to_vmem [thread:$0]  %s481_s1, 2048, %s29_s27, [#allocation6], %s412_s0, %s412_s0, %s413_s9  }
  0x24   :  { %402 = dma.done.wait [#allocation3], 256  }
  0x25   :  { %403 = vsyncadd [#allocation3], 4294967040 }
  0x26   :  { %404 = dma.done.wait [#allocation6], 2048  }
  0x27   :  { %405 = vsyncadd [#allocation6], 4294965248  ;;  %v317_v0 = vld [vmem:[#allocation5 + $0x40] sm:$0xff]   ;;  %v319_v2 = vld [vmem:[#allocation5 + $0x48] sm:$0xff]   ;;  %s414_s13 = smov [#allocation7]  }
  0x28   :  { %v318_v1 = vld [vmem:[#allocation5] sm:$0xff]   ;;  %288 = vmatprep.subr.bf16.mxu0 %v317_v0  ;;  %v320_v3 = vld [vmem:[#allocation5 + $0x8] sm:$0xff]   ;;  %v321_v4 = vld [vmem:[#allocation5 + $0x50] sm:$0xff]   ;;  %s247_s14 = sshll.u32 %s414_s13, 4  ;;  %s248_s14 = int_to_ptr.vmem [resolvable:$true] %s247_s14 }
  0x29   :  { %289 = vmatpush3.bf16.msra.mxu0 %v318_v1  ;;  %v322_v5 = vld [vmem:[#allocation5 + $0x10] sm:$0xff]   ;;  %v323_v6 = vld [vmem:[#allocation5 + $0x58] sm:$0xff]   ;;  %v325_v8 = vld [vmem:[#allocation5 + $0x60] sm:$0xff]   ;;  %s380_s15 = scalar_lea.vmem %s248_s14, 128  ;;  %p385_p3 = scmp.lt.s32.totalorder %s248_s14, %s248_s14 }
  0x2a   :  { %290 = vmatprep.subr.bf16.mxu0 %v319_v2  ;;  %v324_v7 = vld [vmem:[#allocation5 + $0x18] sm:$0xff]   ;;  %v326_v9 = vld [vmem:[#allocation5 + $0x20] sm:$0xff]   ;;  %v327_v10 = vld [vmem:[#allocation5 + $0x68] sm:$0xff]   ;;  %p381_p2 = scmp.ne.s32.totalorder %s248_s14, %s380_s15  ;;  %p386_p4 = scmp.lt.s32.totalorder %s380_s15, %s380_s15 }
  0x2b   :  { %v335_v11 = vld [vmem:[#allocation2 + $0x4] ss:$8 sps:$4 sm:$0xff]   ;;  %v328_v12 = vld [vmem:[#allocation5 + $0x28] sm:$0xff]   ;;  %v333_v17 = vld [vmem:[#allocation2] ss:$8 sps:$4 sm:$0xff]  }
  0x2c   :  { %223 = vmatprep.mubr.bf16.mxu0 %v335_v11  ;;  %v329_v13 = vld [vmem:[#allocation5 + $0x70] sm:$0xff]   ;;  %v331_v15 = vld [vmem:[#allocation5 + $0x78] sm:$0xff]   ;;  %p387_p5 = por %p386_p4, %p385_p3 }
  0x2d   :  { %291 = vmatpush3.bf16.msra.mxu0 %v320_v3  ;;  %v330_v14 = vld [vmem:[#allocation5 + $0x30] sm:$0xff]   ;;  %v332_v16 = vld [vmem:[#allocation5 + $0x38] sm:$0xff]  }
  0x2e   :  { %292 = vmatprep.subr.bf16.mxu0 %v321_v4  ;;  %v260_v22 = vld [vmem:[%s482_s2] ss:$0 sm:$0xff]  ;;  %p388_p6 = pnand %p387_p5, %p381_p2 }
  0x31   :  { %293 = vmatpush3.bf16.msra.mxu0 %v322_v5 }
  0x32   :  { %294 = vmatprep.subr.bf16.mxu0 %v323_v6 }
  0x35   :  { %295 = vmatpush3.bf16.msra.mxu0 %v324_v7 }
  0x36   :  { %296 = vmatprep.subr.bf16.mxu0 %v325_v8 }
  0x39   :  { %297 = vmatpush3.bf16.msra.mxu0 %v326_v9 }
  0x3a   :  { %298 = vmatprep.subr.bf16.mxu0 %v327_v10 }
  0x3d   :  { %299 = vmatpush3.bf16.msra.mxu0 %v328_v12 }
  0x3e   :  { %300 = vmatprep.subr.bf16.mxu0 %v329_v13 }
  0x41   :  { %301 = vmatpush3.bf16.msra.mxu0 %v330_v14 }
  0x42   :  { %302 = vmatprep.subr.bf16.mxu0 %v331_v15 }
  0x45   :  { %303 = vmatpush3.bf16.msra.mxu0 %v332_v16 }
  0x48   :  { %224 = vmatmul.mubr.bf16.vlgmr.msra.gmra.mrb[0].mxu0 %v333_v17 }
 0x11b   :  { %v304_v18 = vpop.f32.mrb[0].mxu0 }
 0x11c   :  { %v305_v19 = vpop.f32.mrb[1].mxu0 }
 0x11d   :  { %v306_v20 = vadd.f32 %v305_v19, %v304_v18  ;;  %v307_v21 = vpop.f32.mrb[2].mxu0 }
 0x11e   :  { %v308_v23 = vpop.f32.mrb[3].mxu0 }
 0x11f   :  { %v309_v24 = vadd.f32 %v308_v23, %v307_v21  ;;  %v226_v25 = vadd.f32 %v306_v20, %v260_v22 }
 0x121   :  { %v229_v26 = vadd.f32 %v309_v24, %v260_v22 }
 0x123   :  { %v286_v27 = vpack.c.bf16 %v229_v26, %v226_v25 }
 0x125   :  { %287 = vst [vmem:[#allocation7] sm:$0xff] %v286_v27  }
 0x126   :  { %391 = shalt.err (!%p388_p6)
}
 0x127   :  { %s392_s2 = scalar_lea.hbm %s483_s3, 128 }
 0x128   :  { %p393_p7 = scmp.ne.s32.totalorder %s483_s3, %s392_s2  ;;  %p396_p8 = scmp.lt.u32.totalorder %s392_s2, %s483_s3 }
 0x12a   :  { %p398_p9 = pnand %p396_p8, %p393_p7 }
 0x12c   :  { %401 = shalt.err (!%p398_p9)
}
 0x12d   :  { %253 = dma.vmem_to_hbm [thread:$0]  %s248_s14, 128, %s483_s3, [#allocation4], %s412_s0, %s412_s0, %s413_s9  }
 0x12e   :  { %406 = dma.done.wait [#allocation4], 128  }
 0x12f   :  { %407 = vsyncadd [#allocation4], 4294967168 }
 0x130   :  { %257 = vsyncpa [#allocation3], 1 }
 0x131   :  { %258 = vsyncpa [#allocation6], 1 }
 0x132   :  { %259 = vsyncpa [#allocation4], 1 }

</bundles_post_ra>
